<compile_context>
chip_gen: v5e
topology: v5e:2x2
jax: 0.10.0
libtpu: 0.0.40
codegen_flags: <defaults>
</compile_context>

<pallas_src>
import math

import jax
import jax.numpy as jnp
from jax.experimental import pallas as pl
from jax.experimental.pallas import tpu as pltpu


def _round_up(n, m):
    return ((n + m - 1) // m) * m


def _adv_net_kernel(b_ref, x_ref, w_ref, o_ref):
    """One batch tile of  y = sigmoid(x @ W_block + b_fold).

    b_ref : SMEM (1, 1)     folded scalar bias
    x_ref : VMEM (TB, Fp)   packed batch tile (double-buffered by BlockSpec)
    w_ref : VMEM (Fp, k)    block-diagonal folded weight (constant index_map ->
                            fetched once, VMEM resident)
    o_ref : VMEM (TB, k)
    """
    # Upcast rides in VPU slack; mandatory on v5e (no bf16 VALU) when x is bf16.
    x = x_ref[...].astype(jnp.float32)
    w = w_ref[...].astype(jnp.float32)
    # Memory-bound kernel: the MXU has full slack, so the N=k matmul is free
    # and also performs the k-segment lane reduction of the packed layout.
    logits = jnp.dot(x, w, preferred_element_type=jnp.float32) + b_ref[0, 0]
    # Exact sigmoid (division, not approx reciprocal): stays strictly in (0, 1).
    o_ref[...] = (1.0 / (1.0 + jnp.exp(-logits))).astype(o_ref.dtype)


def adversarial_network_forward(x, w1, b1, w2, b2, w3, b3,
                                *, vmem_budget_bytes=12 * 1024 * 1024):
    """Forward of AdversarialNetwork:  sigmoid(L3(L2(L1(x)))).

    x : (B, in_feature)   -- streamed in its own dtype (pass bf16 to halve HBM)
    w1: (in_feature, H)  b1: (1, H)      with H = hidden_size + 1
    w2: (H, H)           b2: (1, H)
    w3: (H, 1)           b3: (1, 1)
    returns (B, 1) float32 in (0, 1).

    Weights are stored pre-transposed as (in, out) so L(z) = z @ W + b.
    """
    B, F = x.shape
    f32 = jnp.float32

    # --- trace-time fold of the three affine layers (tiny one-off XLA ops) ---
    w1f, w2f, w3f = w1.astype(f32), w2.astype(f32), w3.astype(f32)
    b1f, b2f, b3f = b1.astype(f32), b2.astype(f32), b3.astype(f32)
    w_fold = w1f @ w2f @ w3f                       # (F, 1)
    b_fold = (b1f @ w2f + b2f) @ w3f + b3f         # (1, 1)

    # --- lane packing for small F: (B, F) -> (B/k, k*F) is a free reshape -----
    k = 1
    if F < 128 and 128 % F == 0:
        k = math.gcd(128 // F, B)                  # reshape needs B % k == 0
    Bp, Fp = B // k, k * F
    xp = x.reshape(Bp, Fp)
    # Block-diagonal weight kron(I_k, W_fold): out[r, j] = x[r*k + j, :] . w_fold
    w_block = jnp.kron(jnp.eye(k, dtype=f32), w_fold)         # (Fp, k)

    # --- adaptive batch tile ---------------------------------------------------
    xbytes = x.dtype.itemsize
    sub = 8 * max(1, 4 // xbytes)                  # sublane multiple (8 f32, 16 bf16)
    lanes_x = _round_up(Fp, 128)
    # double-buffered x block + double-buffered (lane-padded to 128) out block
    bytes_per_row = 2 * (lanes_x * xbytes + 128 * 4)
    if Bp <= sub:
        tb = Bp                                    # single block == full array dim
    else:
        tb_budget = max(sub, (vmem_budget_bytes // bytes_per_row) // sub * sub)
        # keep >= 2 grid steps so v7x's two TensorCores both get work
        tb_cap = max(sub, _round_up(pl.cdiv(Bp, 2), sub))
        tb = min(tb_budget, tb_cap)
    grid = (pl.cdiv(Bp, tb),)                      # no jnp.pad: tail block OOB-masked

    out = pl.pallas_call(
        _adv_net_kernel,
        out_shape=jax.ShapeDtypeStruct((Bp, k), f32),
        grid=grid,
        in_specs=[
            # folded bias: a single f32 scalar in SMEM (no padded VMEM tile).
            pl.BlockSpec(memory_space=pltpu.MemorySpace.SMEM),
            # x: one (tb, Fp) tile per grid step -> double-buffered HBM->VMEM
            # pipeline; the tail block reads garbage rows (independent) and
            # its out-of-bounds stores are dropped by Pallas.
            pl.BlockSpec((tb, Fp), lambda i: (i, 0)),
            # folded block-diagonal weight: constant index_map -> resident.
            pl.BlockSpec((Fp, k), lambda i: (0, 0)),
        ],
        out_specs=pl.BlockSpec((tb, k), lambda i: (i, 0)),
        compiler_params=pltpu.CompilerParams(
            # batch axis is embarrassingly parallel -> shards across the two
            # TensorCores on v7x; a wash (harmless) on single-TC v5e/v6e.
            dimension_semantics=("parallel",),
            vmem_limit_bytes=32 * 1024 * 1024,
        ),
        cost_estimate=pl.CostEstimate(
            flops=2 * B * F,
            transcendentals=B,
            bytes_accessed=B * F * xbytes + B * 4 + Fp * k * 4,
        ),
    )(b_fold, xp, w_block)

    # (Bp, k) row-major flatten restores the original batch order.
    return out.reshape(B, 1)


def init_params(key, in_feature, hidden_size):
    """Deterministic parameter init mirroring nn.Linear default shapes.

    PyTorch stores Linear weight as (out, in); we store the transpose (in, out)
    so the forward does x @ W + b (same math as F.linear(x, W_pt, b)).
    """
    h1 = hidden_size + 1
    ks = jax.random.split(key, 6)

    def linear(kw, kb, fan_in, fan_out):
        bound = 1.0 / jnp.sqrt(jnp.float32(fan_in))
        w = jax.random.uniform(kw, (fan_in, fan_out), jnp.float32, -bound, bound)
        b = jax.random.uniform(kb, (1, fan_out), jnp.float32, -bound, bound)
        return w, b

    w1, b1 = linear(ks[0], ks[1], in_feature, h1)
    w2, b2 = linear(ks[2], ks[3], h1, h1)
    w3, b3 = linear(ks[4], ks[5], h1, 1)
    return w1, b1, w2, b2, w3, b3


if __name__ == "__main__":
    key = jax.random.PRNGKey(0)
    k_x, k_p = jax.random.split(key)

    batch = 8
    in_feature = 32
    hidden_size = 32  # ad_layer1/2 have hidden_size + 1 = 33 units

    x = jax.random.normal(k_x, (batch, in_feature), jnp.float32)
    w1, b1, w2, b2, w3, b3 = init_params(k_p, in_feature, hidden_size)

    def reference(xx):
        return jax.nn.sigmoid(((xx @ w1 + b1) @ w2 + b2) @ w3 + b3)

    # Small batch: single grid step, lane packing k = 128 // 32 = 4.
    y = jax.block_until_ready(
        adversarial_network_forward(x, w1, b1, w2, b2, w3, b3))
    ref = reference(x)
    assert y.shape == (batch, 1)
    assert bool(jnp.all(jnp.isfinite(y)))
    # Tolerance accommodates the trace-time weight fold (re-associated matmuls).
    assert jnp.allclose(y, ref, atol=2e-3, rtol=2e-3), float(jnp.max(jnp.abs(y - ref)))

    # Larger, non-tile-multiple batch: exercises the padding-free cdiv tail and
    # the multi-step "parallel" grid.
    x_big = jax.random.normal(jax.random.PRNGKey(1), (1000, in_feature), jnp.float32)
    y_big = jax.block_until_ready(
        adversarial_network_forward(x_big, w1, b1, w2, b2, w3, b3))
    ref_big = reference(x_big)
    assert y_big.shape == (1000, 1)
    assert jnp.allclose(y_big, ref_big, atol=2e-3, rtol=2e-3)

    print("KERNEL_OK")
</pallas_src>

<mosaic_0001>
module attributes {stable_mosaic.version = 11 : i64} {
  func.func @_adv_net_kernel(%arg0: i32, %arg1: memref<1x1xf32, #tpu.memory_space<smem>>, %arg2: memref<2x128xf32, #tpu.memory_space<vmem>>, %arg3: memref<128x4xf32, #tpu.memory_space<vmem>>, %arg4: memref<2x4xf32, #tpu.memory_space<vmem>>) attributes {dimension_semantics = [#tpu.dimension_semantics<parallel>], iteration_bounds = array<i64: 1>, scalar_prefetch = 0 : i64, scratch_operands = 0 : i64, tpu.core_type = #tpu.core_type<tc>, window_params = [{transform_indices = @transform_0, window_bounds = array<i64: 1, 1>}, {transform_indices = @transform_1, window_bounds = array<i64: 2, 128>}, {pipeline_mode = #tpu.pipeline_mode<synchronous>, transform_indices = @transform_2, window_bounds = array<i64: 128, 4>}, {transform_indices = @transform_3, window_bounds = array<i64: 2, 4>}]} {
    %c0 = arith.constant 0 : index
    %c0_0 = arith.constant 0 : index
    %0 = vector.load %arg2[%c0, %c0_0] : memref<2x128xf32, #tpu.memory_space<vmem>>, vector<2x128xf32>
    %c0_1 = arith.constant 0 : index
    %c0_2 = arith.constant 0 : index
    %1 = vector.load %arg3[%c0_1, %c0_2] : memref<128x4xf32, #tpu.memory_space<vmem>>, vector<128x4xf32>
    %cst = arith.constant dense<0.000000e+00> : vector<2x4xf32>
    %2 = tpu.matmul %0, %1, %cst {dimension_numbers = #tpu.dot_dimension_numbers<[1], [0], [0], [1], [0, 0, 1, 1], [], []>} : vector<2x128xf32>, vector<128x4xf32>, vector<2x4xf32> -> vector<2x4xf32>
    %c0_3 = arith.constant 0 : index
    %c0_4 = arith.constant 0 : index
    %3 = memref.load %arg1[%c0_3, %c0_4] : memref<1x1xf32, #tpu.memory_space<smem>>
    %4 = vector.broadcast %3 : f32 to vector<2x4xf32>
    %5 = arith.addf %2, %4 : vector<2x4xf32>
    %cst_5 = arith.constant 0.000000e+00 : f32
    %6 = vector.broadcast %cst_5 : f32 to vector<2x4xf32>
    %7 = arith.subf %6, %5 : vector<2x4xf32>
    %8 = math.exp %7 : vector<2x4xf32>
    %cst_6 = arith.constant 1.000000e+00 : f32
    %9 = vector.broadcast %cst_6 : f32 to vector<2x4xf32>
    %10 = arith.addf %9, %8 : vector<2x4xf32>
    %cst_7 = arith.constant 1.000000e+00 : f32
    %11 = vector.broadcast %cst_7 : f32 to vector<2x4xf32>
    %12 = arith.divf %11, %10 : vector<2x4xf32>
    %c0_8 = arith.constant 0 : index
    %c0_9 = arith.constant 0 : index
    %13 = vector.load %arg4[%c0_8, %c0_9] : memref<2x4xf32, #tpu.memory_space<vmem>>, vector<2x4xf32>
    tpu.vector_store %arg4[%c0_8, %c0_9], %12 {strides = array<i32>} : memref<2x4xf32, #tpu.memory_space<vmem>>, vector<2x4xf32>,
    return
  }
  func.func @transform_0(%arg0: i32) -> (i32, i32) {
    %c0_i32 = arith.constant 0 : i32
    %c0_i32_0 = arith.constant 0 : i32
    %c0_i32_1 = arith.constant 0 : i32
    return %c0_i32, %c0_i32_0 : i32, i32
  }
  func.func @transform_1(%arg0: i32) -> (i32, i32) {
    %c0_i32 = arith.constant 0 : i32
    %c0_i32_0 = arith.constant 0 : i32
    return %arg0, %c0_i32 : i32, i32
  }
  func.func @transform_2(%arg0: i32) -> (i32, i32) {
    %c0_i32 = arith.constant 0 : i32
    %c0_i32_0 = arith.constant 0 : i32
    %c0_i32_1 = arith.constant 0 : i32
    return %c0_i32, %c0_i32_0 : i32, i32
  }
  func.func @transform_3(%arg0: i32) -> (i32, i32) {
    %c0_i32 = arith.constant 0 : i32
    %c0_i32_0 = arith.constant 0 : i32
    return %arg0, %c0_i32 : i32, i32
  }
}

</mosaic_0001>

<bundles_post_ra>
// kernel: tpu_custom_call.1
= control target key start
LH: loop header
LB: loop body
LE: loop exit
PB: predicated region body
PF: predicated region fallthrough
CT: control target
= control target key end

     0   :  { %s201_s0 = inlined_call_operand.<no memory space> [shape: f32[1,1], index: 0, kind: input, shape index: {}]   ;;  %s202_s1 = inlined_call_operand.vmem [shape: f32[2,128], index: 1, kind: input, shape index: {}]   ;;  %s203_s2 = inlined_call_operand.vmem [shape: f32[128,4], index: 2, kind: input, shape index: {}]   ;;  %s204_s3 = inlined_call_operand.hbm [shape: f32[2,4], index: 3, kind: output, shape index: {}]  }
   0x1   :  { %v32_v0 = vld [vmem:[%s203_s2 + $0x78] sm:$0xff]  ;;  %v31_v1 = vld [vmem:[%s203_s2 + $0x70] sm:$0xff]  ;;  %v30_v2 = vld [vmem:[%s203_s2 + $0x68] sm:$0xff] }
   0x2   :  { %35 = vmatpush.msra.mxu0 %v32_v0  ;;  %v29_v3 = vld [vmem:[%s203_s2 + $0x60] sm:$0xff] }
   0x4   :  { %36 = vmatpush.msra.mxu0 %v31_v1 }
   0x6   :  { %37 = vmatpush.msra.mxu0 %v30_v2 }
   0x7   :  { %9 = vsyncpa [#allocation4], 0  ;;  %v28_v4 = vld [vmem:[%s203_s2 + $0x58] sm:$0xff]  ;;  %v27_v5 = vld [vmem:[%s203_s2 + $0x50] sm:$0xff]  ;;  %v34_v17 = vstv %s201_s0  ;;  %s83_s0 = sshll.u32 %s204_s3, 4  ;;  %vm74_vm3 = vcmask 25600   ;;  %s84_s0 = int_to_ptr.hbm [resolvable:$true] %s83_s0 }
   0x8   :  { %38 = vmatpush.msra.mxu0 %v29_v3  ;;  %v26_v6 = vld [vmem:[%s203_s2 + $0x48] sm:$0xff]  ;;  %v25_v7 = vld [vmem:[%s203_s2 + $0x40] sm:$0xff]  ;;  %v24_v8 = vld [vmem:[%s203_s2 + $0x38] sm:$0xff] }
   0x9   :  { %v23_v9 = vld [vmem:[%s203_s2 + $0x30] sm:$0xff]  ;;  %v22_v10 = vld [vmem:[%s203_s2 + $0x28] sm:$0xff]  ;;  %v21_v11 = vld [vmem:[%s203_s2 + $0x20] sm:$0xff] }
   0xa   :  { %39 = vmatpush.msra.mxu0 %v28_v4  ;;  %v20_v12 = vld [vmem:[%s203_s2 + $0x18] sm:$0xff]  ;;  %v19_v13 = vld [vmem:[%s203_s2 + $0x10] sm:$0xff]  ;;  %v18_v14 = vld [vmem:[%s203_s2 + $0x8] sm:$0xff] }
   0xb   :  { %v17_v15 = vld [vmem:[%s203_s2] sm:$0xff] }
   0xc   :  { %40 = vmatpush.msra.mxu0 %v27_v5  ;;  %v16_v16 = vld [vmem:[%s202_s1] sm:$0x3]  ;;  %s123_s1 = smov [#allocation3]  }
   0xd   :  { %s81_s2 = sshll.u32 %s123_s1, 4  ;;  %s82_s2 = int_to_ptr.vmem [resolvable:$true] %s81_s2 }
   0xe   :  { %41 = vmatpush.msra.mxu0 %v26_v6 }
  0x10   :  { %42 = vmatpush.msra.mxu0 %v25_v7 }
  0x12   :  { %43 = vmatpush.msra.mxu0 %v24_v8 }
  0x14   :  { %44 = vmatpush.msra.mxu0 %v23_v9 }
  0x16   :  { %45 = vmatpush.msra.mxu0 %v22_v10 }
  0x18   :  { %46 = vmatpush.msra.mxu0 %v21_v11 }
  0x1a   :  { %47 = vmatpush.msra.mxu0 %v20_v12 }
  0x1c   :  { %48 = vmatpush.msra.mxu0 %v19_v13 }
  0x1e   :  { %49 = vmatpush.msra.mxu0 %v18_v14 }
  0x20   :  { %50 = vmatpush.msra.mxu0 %v17_v15 }
  0x21   :  { %51 = vmatmul.f32.vlgmr.msra.gmra.mxu0 %v16_v16 }
  0x9e   :  { %v52_v18 = vpop.f32.mrf.mxu0 }
  0x9f   :  { %v53_v19 = vadd.f32 %v52_v18, %v34_v17 }
  0xa1   :  { %v55_v20 = vsub.f32 0.0, %v53_v19 }
  0xa3   :  { %v56_v21 = vmul.f32 1.442695, %v55_v20 }
  0xa5   :  { %93 = vpow2.f32 %v56_v21 }
  0xab   :  { %v94_v22 = vpop.eup %93 }
  0xac   :  { %v58_v23 = vadd.f32 1.0, %v94_v22 }
  0xae   :  { %95 = vrcp.f32 %v58_v23  ;;  %v70_v27 = vand.u32 2147483648, %v58_v23  ;;  %v68_v29 = vand.u32 2147483647, %v58_v23  ;;  %vm64_vm1 = vweird.f32 %v58_v23 }
  0xb0   :  { %v71_v31 = vor.u32 1.1754944e-38, %v70_v27  ;;  %vm69_vm4 = vcmp.eq.f32.partialorder %v68_v29, 8.507059e+37 }
  0xb4   :  { %v96_v24 = vpop.eup %95 }
  0xb5   :  { %v60_v25 = vmul.f32 %v96_v24, %v58_v23  ;;  %vm65_vm0 = vweird.f32 %v96_v24 }
  0xb6   :  { %vm66_vm2 = vmor %vm64_vm1, %vm65_vm0 }
  0xb7   :  { %v61_v26 = vsub.f32 1.0, %v60_v25 }
  0xb9   :  { %v62_v28 = vmul.f32 %v96_v24, %v61_v26 }
  0xbb   :  { %v63_v30 = vadd.f32 %v96_v24, %v62_v28 }
  0xbd   :  { %v67_v32 = vsel %vm66_vm2, %v96_v24, %v63_v30 }
  0xbe   :  { %v72_v33 = vsel %vm69_vm4, %v71_v31, %v67_v32 }
  0xbf   :  { %75 = vst.msk [vmem:[#allocation3] sm:$0x3] %vm74_vm3, %v72_v33 }
  0xc0   :  { %86 = dma.vmem_to_hbm [thread:$0]  %s82_s2, 32, %s84_s0, [#allocation4]  }
  0xc1   :  { %121 = dma.done.wait [#allocation4], 32  }
  0xc2   :  { %122 = vsyncadd [#allocation4], 4294967264 }
  0xc3   :  { %91 = vsyncpa [#allocation4], 1 }

</bundles_post_ra>
